<compile_context>
chip_gen: v7x
topology: tpu7x:2x2x1
jax: 0.10.0
libtpu: 0.0.40
codegen_flags: <defaults>
</compile_context>

<pallas_src>
import functools
import math
from typing import NamedTuple, Tuple

import jax
import jax.numpy as jnp
from jax.experimental import pallas as pl
from jax.experimental.pallas import tpu as pltpu


def _round_up(x, m):
    return ((x + m - 1) // m) * m


class CNNConfig(NamedTuple):
    input_length: int
    vocab_size: int
    output_size: int
    hidden_size: int
    kernel_sizes: Tuple[int, ...]
    num_filters: int


def _derived(cfg: CNNConfig):
    L, V = cfg.input_length, cfg.vocab_size
    o_list = tuple(L - ks + 1 for ks in cfg.kernel_sizes)
    c_real = sum(o * cfg.num_filters for o in o_list)          # PyTorch cnn_output_size
    kx_pad = _round_up(L * V, 128)                              # conv contraction lanes
    c_pad = _round_up(c_real, 128)                              # conv-output / mlp1-in lanes
    h_pad = _round_up(cfg.hidden_size, 128)
    out_pad = _round_up(cfg.output_size, 128)
    return o_list, c_real, kx_pad, c_pad, h_pad, out_pad


# ----------------------------------------------------------------------------
# Fused kernel: one grid step per batch tile, three matmuls, no loops, no scratch.
# ----------------------------------------------------------------------------
def _fused_cnn_kernel(x_ref, wc_ref, bc_ref, w1_ref, b1_ref, w2_ref, b2_ref, o_ref):
    # x_ref : (TB, KX_PAD)      bf16   flattened (l, v) input rows
    # wc_ref: (KX_PAD, C_PAD)   bf16   all conv branches/taps/positions packed in columns
    # bc_ref: (1, C_PAD)        f32    conv biases broadcast over positions
    # w1_ref: (C_PAD, H_PAD)    bf16   mlp1 weight (transposed, padded)
    # b1_ref: (1, H_PAD)        f32
    # w2_ref: (H_PAD, OUT_PAD)  bf16
    # b2_ref: (1, OUT_PAD)      f32
    # o_ref : (TB, OUT_PAD)     f32
    conv = jnp.dot(x_ref[...], wc_ref[...], preferred_element_type=jnp.float32)
    act = jnp.maximum(conv + bc_ref[...], 0.0).astype(jnp.bfloat16)
    # Dropout is eval-mode identity.
    # TODO(synk): training-mode dropout (pltpu.prng_random_bits mask) not implemented.
    h = (jnp.dot(act, w1_ref[...], preferred_element_type=jnp.float32)
         + b1_ref[...]).astype(jnp.bfloat16)
    o_ref[...] = jnp.dot(h, w2_ref[...], preferred_element_type=jnp.float32) + b2_ref[...]


# ----------------------------------------------------------------------------
# Parameter construction (PyTorch layout) — used by the pure-JAX reference.
# ----------------------------------------------------------------------------
def init_params(key, cfg: CNNConfig):
    L, V, O, H, F = (cfg.input_length, cfg.vocab_size, cfg.output_size,
                     cfg.hidden_size, cfg.num_filters)
    params = {"convs": []}
    cnn_output_size = 0
    for ks in cfg.kernel_sizes:
        key, kw, kb = jax.random.split(key, 3)
        bound = 1.0 / math.sqrt(V * ks)
        w = jax.random.uniform(kw, (F, V, ks), jnp.float32, -bound, bound)
        b = jax.random.uniform(kb, (F,), jnp.float32, -bound, bound)
        params["convs"].append((w, b))
        cnn_output_size += (L - ks + 1) * F
    key, k1w, k1b, k2w, k2b = jax.random.split(key, 5)
    b1lim = 1.0 / math.sqrt(cnn_output_size)
    b2lim = 1.0 / math.sqrt(H)
    params["mlp1_w"] = jax.random.uniform(k1w, (H, cnn_output_size), jnp.float32, -b1lim, b1lim)
    params["mlp1_b"] = jax.random.uniform(k1b, (H,), jnp.float32, -b1lim, b1lim)
    params["mlp2_w"] = jax.random.uniform(k2w, (O, H), jnp.float32, -b2lim, b2lim)
    params["mlp2_b"] = jax.random.uniform(k2b, (O,), jnp.float32, -b2lim, b2lim)
    return params


# ----------------------------------------------------------------------------
# Packing: fold permute + conv structure + PyTorch flatten order + Linear transposes +
# all zero padding into the weights ONCE, outside the jitted forward.
# ----------------------------------------------------------------------------
def pack_params(params, cfg: CNNConfig):
    L, V = cfg.input_length, cfg.vocab_size
    F, H, O = cfg.num_filters, cfg.hidden_size, cfg.output_size
    o_list, c_real, kx_pad, c_pad, h_pad, out_pad = _derived(cfg)

    wc = jnp.zeros((kx_pad, c_pad), jnp.float32)
    bc = jnp.zeros((1, c_pad), jnp.float32)
    off = 0
    for (w, b), ks, o_i in zip(params["convs"], cfg.kernel_sizes, o_list):
        # w: (F, V, ks).  Column index within the branch is f*o_i + t (PyTorch .view flatten
        # of the (B, F, o_i) conv output).  Row index is l*V + v (row-major flatten of x).
        l_idx = jnp.arange(L)[:, None]                       # (L, 1)
        t_idx = jnp.arange(o_i)[None, :]                     # (1, o_i)
        dk = l_idx - t_idx                                   # (L, o_i)
        valid = (dk >= 0) & (dk < ks)
        dk_c = jnp.clip(dk, 0, ks - 1)
        w_g = w[:, :, dk_c]                                  # (F, V, L, o_i)
        w_g = jnp.where(valid[None, None], w_g, 0.0)
        blk = jnp.transpose(w_g, (2, 1, 0, 3)).reshape(L * V, F * o_i)
        wc = wc.at[:L * V, off:off + F * o_i].set(blk)
        bc = bc.at[0, off:off + F * o_i].set(jnp.repeat(b, o_i))
        off += F * o_i

    # Padded columns [c_real, c_pad) have zero conv weight AND zero bias AND zero w1 rows,
    # so they contribute nothing (padding invariant preserved by construction).
    w1 = jnp.zeros((c_pad, h_pad), jnp.float32).at[:c_real, :H].set(params["mlp1_w"].T)
    b1 = jnp.zeros((1, h_pad), jnp.float32).at[0, :H].set(params["mlp1_b"])
    w2 = jnp.zeros((h_pad, out_pad), jnp.float32).at[:H, :O].set(params["mlp2_w"].T)
    b2 = jnp.zeros((1, out_pad), jnp.float32).at[0, :O].set(params["mlp2_b"])

    return {"wc": wc.astype(jnp.bfloat16), "bc": bc,
            "w1": w1.astype(jnp.bfloat16), "b1": b1,
            "w2": w2.astype(jnp.bfloat16), "b2": b2}


# ----------------------------------------------------------------------------
# Forward
# ----------------------------------------------------------------------------
@functools.partial(jax.jit, static_argnames=("cfg",))
def cnn_forward(x, packed, cfg: CNNConfig):
    """x: (B, L, V) float32 -> y: (B, output_size) float32."""
    B, L, V = x.shape
    o_list, c_real, kx_pad, c_pad, h_pad, out_pad = _derived(cfg)
    F, H, O = cfg.num_filters, cfg.hidden_size, cfg.output_size

    # Batch tiling: keep tiles big for large B, but (for v7x) give the parallel axis at
    # least 2 programs whenever B > 8 so both TensorCores get work.
    if B <= 8:
        tb = 8
    else:
        tb = min(512, _round_up((B + 1) // 2, 8))
    b_pad = _round_up(B, tb)
    n_tiles = b_pad // tb

    # Compact x in HBM: only batch rows and (if needed) the contraction lanes are padded.
    x_flat = x.reshape(B, L * V).astype(jnp.bfloat16)
    x_p = jnp.zeros((b_pad, kx_pad), jnp.bfloat16).at[:B, :L * V].set(x_flat)

    # Real (unpadded) work for the scheduler hint.
    real_flops = 2 * B * (sum(o * ks for o, ks in zip(o_list, cfg.kernel_sizes)) * V * F
                          + c_real * H + H * O)
    bytes_accessed = (x_p.size * 2
                      + packed["wc"].size * 2 + packed["w1"].size * 2 + packed["w2"].size * 2
                      + (packed["bc"].size + packed["b1"].size + packed["b2"].size) * 4
                      + b_pad * out_pad * 4)

    out = pl.pallas_call(
        _fused_cnn_kernel,
        out_shape=jax.ShapeDtypeStruct((b_pad, out_pad), jnp.float32),
        grid_spec=pltpu.PrefetchScalarGridSpec(
            num_scalar_prefetch=0,
            grid=(n_tiles,),                                   # purely parallel over batch
            in_specs=[
                pl.BlockSpec((tb, kx_pad), lambda i: (i, 0)),
                pl.BlockSpec((kx_pad, c_pad), lambda i: (0, 0)),
                pl.BlockSpec((1, c_pad), lambda i: (0, 0)),
                pl.BlockSpec((c_pad, h_pad), lambda i: (0, 0)),
                pl.BlockSpec((1, h_pad), lambda i: (0, 0)),
                pl.BlockSpec((h_pad, out_pad), lambda i: (0, 0)),
                pl.BlockSpec((1, out_pad), lambda i: (0, 0)),
            ],
            out_specs=pl.BlockSpec((tb, out_pad), lambda i: (i, 0)),
        ),
        compiler_params=pltpu.CompilerParams(
            dimension_semantics=("parallel",)),
        cost_estimate=pl.CostEstimate(
            flops=real_flops, transcendentals=0, bytes_accessed=bytes_accessed),
    )(x_p, packed["wc"], packed["bc"], packed["w1"], packed["b1"],
      packed["w2"], packed["b2"])

    return out[:B, :O]


# ----------------------------------------------------------------------------
# Pure-JAX f32 reference (sanity check only).
# ----------------------------------------------------------------------------
def cnn_reference(x, params, kernel_sizes):
    B, L, V = x.shape
    x_bvl = jnp.transpose(x, (0, 2, 1))
    outs = []
    for (w, b), ks in zip(params["convs"], kernel_sizes):
        conv = jax.lax.conv_general_dilated(
            x_bvl, w, window_strides=(1,), padding="VALID",
            dimension_numbers=("NCH", "OIH", "NCH"))
        conv = jnp.maximum(conv + b[None, :, None], 0.0)            # (B, F, o)
        outs.append(conv.reshape(B, -1))                            # channel-major flatten
    feat = jnp.concatenate(outs, axis=1)
    h = feat @ params["mlp1_w"].T + params["mlp1_b"]
    return h @ params["mlp2_w"].T + params["mlp2_b"]


if __name__ == "__main__":
    # Config consistent with the module's defaults (num_cnn_layers=1, num_mlp_layers=2,
    # sigmoid=False, stride=1).
    # TODO(synk): num_cnn_layers>1 (MaxPool1d + extra convs) and the optional Sigmoid
    # head are not implemented (module defaults used).
    cfg = CNNConfig(input_length=16, vocab_size=8, output_size=4, hidden_size=32,
                    kernel_sizes=(3, 5), num_filters=8)
    batch = 2

    key = jax.random.PRNGKey(0)
    kx, kp = jax.random.split(key)
    x = jax.random.normal(kx, (batch, cfg.input_length, cfg.vocab_size), jnp.float32)
    params = init_params(kp, cfg)
    packed = pack_params(params, cfg)

    y = cnn_forward(x, packed, cfg)
    y = jax.block_until_ready(y)

    y_ref = cnn_reference(x, params, cfg.kernel_sizes)
    assert y.shape == (batch, cfg.output_size)
    # bf16 matmul operands with f32 accumulation -> relaxed tolerance vs f32 reference.
    assert jnp.allclose(y, y_ref, atol=3e-2, rtol=3e-2), float(jnp.max(jnp.abs(y - y_ref)))

    print("KERNEL_OK")
</pallas_src>

<mosaic_0001>
module attributes {stable_mosaic.version = 11 : i64} {
  func.func @_fused_cnn_kernel(%arg0: i32, %arg1: memref<8x128xbf16, #tpu.memory_space<vmem>>, %arg2: memref<128x256xbf16, #tpu.memory_space<vmem>>, %arg3: memref<1x256xf32, #tpu.memory_space<vmem>>, %arg4: memref<256x128xbf16, #tpu.memory_space<vmem>>, %arg5: memref<1x128xf32, #tpu.memory_space<vmem>>, %arg6: memref<128x128xbf16, #tpu.memory_space<vmem>>, %arg7: memref<1x128xf32, #tpu.memory_space<vmem>>, %arg8: memref<8x128xf32, #tpu.memory_space<vmem>>) attributes {dimension_semantics = [#tpu.dimension_semantics<parallel>], iteration_bounds = array<i64: 1>, scalar_prefetch = 0 : i64, scratch_operands = 0 : i64, tpu.core_type = #tpu.core_type<tc>, window_params = [{transform_indices = @transform_0, window_bounds = array<i64: 8, 128>}, {pipeline_mode = #tpu.pipeline_mode<synchronous>, transform_indices = @transform_1, window_bounds = array<i64: 128, 256>}, {pipeline_mode = #tpu.pipeline_mode<synchronous>, transform_indices = @transform_2, window_bounds = array<i64: 1, 256>}, {pipeline_mode = #tpu.pipeline_mode<synchronous>, transform_indices = @transform_3, window_bounds = array<i64: 256, 128>}, {pipeline_mode = #tpu.pipeline_mode<synchronous>, transform_indices = @transform_4, window_bounds = array<i64: 1, 128>}, {pipeline_mode = #tpu.pipeline_mode<synchronous>, transform_indices = @transform_5, window_bounds = array<i64: 128, 128>}, {pipeline_mode = #tpu.pipeline_mode<synchronous>, transform_indices = @transform_6, window_bounds = array<i64: 1, 128>}, {transform_indices = @transform_7, window_bounds = array<i64: 8, 128>}]} {
    %c0 = arith.constant 0 : index
    %c0_0 = arith.constant 0 : index
    %0 = vector.load %arg1[%c0, %c0_0] : memref<8x128xbf16, #tpu.memory_space<vmem>>, vector<8x128xbf16>
    %c0_1 = arith.constant 0 : index
    %c0_2 = arith.constant 0 : index
    %1 = vector.load %arg2[%c0_1, %c0_2] : memref<128x256xbf16, #tpu.memory_space<vmem>>, vector<128x256xbf16>
    %cst = arith.constant dense<0.000000e+00> : vector<8x256xf32>
    %2 = tpu.matmul %0, %1, %cst {dimension_numbers = #tpu.dot_dimension_numbers<[1], [0], [0], [1], [0, 0, 1, 1], [], []>} : vector<8x128xbf16>, vector<128x256xbf16>, vector<8x256xf32> -> vector<8x256xf32>
    %c0_3 = arith.constant 0 : index
    %c0_4 = arith.constant 0 : index
    %3 = vector.load %arg3[%c0_3, %c0_4] : memref<1x256xf32, #tpu.memory_space<vmem>>, vector<1x256xf32>
    %4 = vector.broadcast %3 : vector<1x256xf32> to vector<8x256xf32>
    %5 = arith.addf %2, %4 : vector<8x256xf32>
    %cst_5 = arith.constant 0.000000e+00 : f32
    %6 = vector.broadcast %cst_5 : f32 to vector<8x256xf32>
    %7 = arith.maximumf %5, %6 : vector<8x256xf32>
    %8 = arith.truncf %7 : vector<8x256xf32> to vector<8x256xbf16>
    %c0_6 = arith.constant 0 : index
    %c0_7 = arith.constant 0 : index
    %9 = vector.load %arg4[%c0_6, %c0_7] : memref<256x128xbf16, #tpu.memory_space<vmem>>, vector<256x128xbf16>
    %cst_8 = arith.constant dense<0.000000e+00> : vector<8x128xf32>
    %10 = tpu.matmul %8, %9, %cst_8 {dimension_numbers = #tpu.dot_dimension_numbers<[1], [0], [0], [1], [0, 0, 1, 1], [], []>} : vector<8x256xbf16>, vector<256x128xbf16>, vector<8x128xf32> -> vector<8x128xf32>
    %c0_9 = arith.constant 0 : index
    %c0_10 = arith.constant 0 : index
    %11 = vector.load %arg5[%c0_9, %c0_10] : memref<1x128xf32, #tpu.memory_space<vmem>>, vector<1x128xf32>
    %12 = vector.broadcast %11 : vector<1x128xf32> to vector<8x128xf32>
    %13 = arith.addf %10, %12 : vector<8x128xf32>
    %14 = arith.truncf %13 : vector<8x128xf32> to vector<8x128xbf16>
    %c0_11 = arith.constant 0 : index
    %c0_12 = arith.constant 0 : index
    %15 = vector.load %arg6[%c0_11, %c0_12] : memref<128x128xbf16, #tpu.memory_space<vmem>>, vector<128x128xbf16>
    %cst_13 = arith.constant dense<0.000000e+00> : vector<8x128xf32>
    %16 = tpu.matmul %14, %15, %cst_13 {dimension_numbers = #tpu.dot_dimension_numbers<[1], [0], [0], [1], [0, 0, 1, 1], [], []>} : vector<8x128xbf16>, vector<128x128xbf16>, vector<8x128xf32> -> vector<8x128xf32>
    %c0_14 = arith.constant 0 : index
    %c0_15 = arith.constant 0 : index
    %17 = vector.load %arg7[%c0_14, %c0_15] : memref<1x128xf32, #tpu.memory_space<vmem>>, vector<1x128xf32>
    %18 = vector.broadcast %17 : vector<1x128xf32> to vector<8x128xf32>
    %19 = arith.addf %16, %18 : vector<8x128xf32>
    %c0_16 = arith.constant 0 : index
    %c0_17 = arith.constant 0 : index
    %20 = vector.load %arg8[%c0_16, %c0_17] : memref<8x128xf32, #tpu.memory_space<vmem>>, vector<8x128xf32>
    tpu.vector_store %arg8[%c0_16, %c0_17], %19 {strides = array<i32>} : memref<8x128xf32, #tpu.memory_space<vmem>>, vector<8x128xf32>,
    return
  }
  func.func @transform_0(%arg0: i32) -> (i32, i32) {
    %c0_i32 = arith.constant 0 : i32
    %c0_i32_0 = arith.constant 0 : i32
    return %arg0, %c0_i32 : i32, i32
  }
  func.func @transform_1(%arg0: i32) -> (i32, i32) {
    %c0_i32 = arith.constant 0 : i32
    %c0_i32_0 = arith.constant 0 : i32
    %c0_i32_1 = arith.constant 0 : i32
    return %c0_i32, %c0_i32_0 : i32, i32
  }
  func.func @transform_2(%arg0: i32) -> (i32, i32) {
    %c0_i32 = arith.constant 0 : i32
    %c0_i32_0 = arith.constant 0 : i32
    %c0_i32_1 = arith.constant 0 : i32
    return %c0_i32, %c0_i32_0 : i32, i32
  }
  func.func @transform_3(%arg0: i32) -> (i32, i32) {
    %c0_i32 = arith.constant 0 : i32
    %c0_i32_0 = arith.constant 0 : i32
    %c0_i32_1 = arith.constant 0 : i32
    return %c0_i32, %c0_i32_0 : i32, i32
  }
  func.func @transform_4(%arg0: i32) -> (i32, i32) {
    %c0_i32 = arith.constant 0 : i32
    %c0_i32_0 = arith.constant 0 : i32
    %c0_i32_1 = arith.constant 0 : i32
    return %c0_i32, %c0_i32_0 : i32, i32
  }
  func.func @transform_5(%arg0: i32) -> (i32, i32) {
    %c0_i32 = arith.constant 0 : i32
    %c0_i32_0 = arith.constant 0 : i32
    %c0_i32_1 = arith.constant 0 : i32
    return %c0_i32, %c0_i32_0 : i32, i32
  }
  func.func @transform_6(%arg0: i32) -> (i32, i32) {
    %c0_i32 = arith.constant 0 : i32
    %c0_i32_0 = arith.constant 0 : i32
    %c0_i32_1 = arith.constant 0 : i32
    return %c0_i32, %c0_i32_0 : i32, i32
  }
  func.func @transform_7(%arg0: i32) -> (i32, i32) {
    %c0_i32 = arith.constant 0 : i32
    %c0_i32_0 = arith.constant 0 : i32
    return %arg0, %c0_i32 : i32, i32
  }
}

</mosaic_0001>

<bundles_post_ra>
// kernel: cnn_forward.1
= control target key start
LH: loop header
LB: loop body
LE: loop exit
PB: predicated region body
PF: predicated region fallthrough
CT: control target
= control target key end

     0   :  { %12 = vsyncpa [#allocation3], 0  ;;  %s813_s0 = inlined_call_operand.vmem [shape: bf16[8,128], index: 0, kind: input, shape index: {}]   ;;  %s814_s1 = inlined_call_operand.hbm [shape: bf16[128,256], index: 1, kind: input, shape index: {}]   ;;  %s815_s2 = inlined_call_operand.vmem [shape: f32[1,256], index: 2, kind: input, shape index: {}]   ;;  %s816_s3 = inlined_call_operand.hbm [shape: bf16[256,128], index: 3, kind: input, shape index: {}]   ;;  %s817_s4 = inlined_call_operand.vmem [shape: f32[1,128], index: 4, kind: input, shape index: {}]   ;;  %s818_s5 = inlined_call_operand.vmem [shape: bf16[128,128], index: 5, kind: input, shape index: {}]   ;;  %s819_s6 = inlined_call_operand.vmem [shape: f32[1,128], index: 6, kind: input, shape index: {}]   ;;  %s820_s7 = inlined_call_operand.vmem [shape: f32[8,128], index: 7, kind: output, shape index: {}]  }
   0x1   :  { %13 = vsyncpa [#allocation5], 0  ;;  %s701_s24 = smov [#allocation2]   ;;  %s653_s28 = scalar_lea.hbm %s814_s1, 2048 }
   0x2   :  { %s21_s25 = sshll.u32 %s701_s24, 4  ;;  %p654_p0 = scmp.ne.s32.totalorder %s814_s1, %s653_s28  ;;  %s22_s25 = int_to_ptr.vmem [resolvable:$true] %s21_s25 }
   0x3   :  { %p657_p1 = scmp.lt.u32.totalorder %s653_s28, %s814_s1 }
   0x5   :  { %p659_p2 = pnand %p657_p1, %p654_p0 }
   0x7   :  { %662 = shalt.err (!%p659_p2)
}
   0x8   :  { %s663_s10 = scalar_lea.vmem %s22_s25, 2048  ;;  %p668_p4 = scmp.lt.s32.totalorder %s22_s25, %s22_s25 }
   0x9   :  { %p664_p3 = scmp.ne.s32.totalorder %s22_s25, %s663_s10  ;;  %p669_p5 = scmp.lt.s32.totalorder %s663_s10, %s663_s10 }
   0xb   :  { %p670_p6 = por %p669_p5, %p668_p4 }
   0xd   :  { %p671_p7 = pnand %p670_p6, %p664_p3 }
   0xf   :  { %674 = shalt.err (!%p671_p7)
}
  0x10   :  { %s702_s11 = smov 128   ;;  %s703_s12 = smov 8  }
  0x11   :  { %27 = dma.hbm_to_vmem [thread:$0]  %s814_s1, 2048, %s22_s25, [#allocation3], %s702_s11, %s702_s11, %s703_s12  }
  0x12   :  { %s704_s15 = smov [#allocation4]   ;;  %s675_s19 = scalar_lea.hbm %s816_s3, 2048 }
  0x13   :  { %s35_s16 = sshll.u32 %s704_s15, 4  ;;  %p676_p8 = scmp.ne.s32.totalorder %s816_s3, %s675_s19  ;;  %s36_s16 = int_to_ptr.vmem [resolvable:$true] %s35_s16 }
  0x14   :  { %p679_p9 = scmp.lt.u32.totalorder %s675_s19, %s816_s3 }
  0x16   :  { %p681_p10 = pnand %p679_p9, %p676_p8 }
  0x18   :  { %684 = shalt.err (!%p681_p10)
}
  0x19   :  { %s685_s24 = scalar_lea.vmem %s36_s16, 2048  ;;  %p690_p12 = scmp.lt.s32.totalorder %s36_s16, %s36_s16 }
  0x1a   :  { %p686_p11 = scmp.ne.s32.totalorder %s36_s16, %s685_s24  ;;  %p691_p13 = scmp.lt.s32.totalorder %s685_s24, %s685_s24 }
  0x1c   :  { %p692_p0 = por %p691_p13, %p690_p12 }
  0x1e   :  { %p693_p1 = pnand %p692_p0, %p686_p11 }
  0x20   :  { %696 = shalt.err (!%p693_p1)
}
  0x21   :  { %s705_s1 = smov 64   ;;  %s706_s25 = smov 4  }
  0x22   :  { %41 = dma.hbm_to_vmem [thread:$0]  %s816_s3, 2048, %s36_s16, [#allocation5], %s705_s1, %s705_s1, %s706_s25  }
  0x23   :  { %697 = dma.done.wait [#allocation3], 2048  }
  0x24   :  { %698 = vsyncadd [#allocation3], 4294965248 }
  0x25   :  { %699 = dma.done.wait [#allocation5], 2048  }
  0x26   :  { %700 = vsyncadd [#allocation5], 4294965248  ;;  %v707_v0 = vmov 0   ;;  %v605_v1 = vld [vmem:[#allocation2 + $0x4] ss:$8 sps:$4 sm:$0xff]   ;;  %v633_v15 = vld [vmem:[#allocation4 + $0x50] sm:$0xff]   ;;  %v74_v41 = vlaneseq }
  0x27   :  { %196 = vmatprep.mubr.bf16.mxu0 %v707_v0  ;;  %v607_v2 = vld [vmem:[#allocation2] ss:$8 sps:$4 sm:$0xff]   ;;  %164 = vmatprep.subr.bf16.mxu0 %v605_v1  ;;  %v608_v3 = vld [vmem:[#allocation2 + $0x14] ss:$8 sps:$4 sm:$0xff]   ;;  %v610_v4 = vld [vmem:[#allocation2 + $0x10] ss:$8 sps:$4 sm:$0xff]  }
  0x28   :  { %165 = vmatpush1.bf16.msra.mxu0 %v607_v2  ;;  %v611_v5 = vld [vmem:[#allocation2 + $0x24] ss:$8 sps:$4 sm:$0xff]   ;;  %v613_v6 = vld [vmem:[#allocation2 + $0x20] ss:$8 sps:$4 sm:$0xff]   ;;  %v614_v7 = vld [vmem:[#allocation2 + $0x34] ss:$8 sps:$4 sm:$0xff]  }
  0x29   :  { %166 = vmatprep.subr.bf16.mxu0 %v608_v3  ;;  %v616_v8 = vld [vmem:[#allocation2 + $0x30] ss:$8 sps:$4 sm:$0xff]   ;;  %v617_v9 = vld [vmem:[#allocation2 + $0x44] ss:$8 sps:$4 sm:$0xff]   ;;  %v619_v12 = vld [vmem:[#allocation2 + $0x40] ss:$8 sps:$4 sm:$0xff]  }
  0x2a   :  { %v629_v10 = vld [vmem:[#allocation4 + $0x40] sm:$0xff]   ;;  %v631_v13 = vld [vmem:[#allocation4 + $0x48] sm:$0xff]   ;;  %v620_v16 = vld [vmem:[#allocation2 + $0x54] ss:$8 sps:$4 sm:$0xff]   ;;  %v708_v35 = vmov 0.0   ;;  %v75_v42 = vshrl.u32 %v74_v41, 7 }
  0x2b   :  { %v630_v11 = vld [vmem:[#allocation4] sm:$0xff]   ;;  %545 = vmatprep.subr.bf16.mxu1 %v629_v10  ;;  %v632_v14 = vld [vmem:[#allocation4 + $0x8] sm:$0xff]   ;;  %v622_v17 = vld [vmem:[#allocation2 + $0x50] ss:$8 sps:$4 sm:$0xff]   ;;  %vm709_vm0 = vmmov 0  }
  0x2c   :  { %167 = vmatpush1.bf16.msra.mxu0 %v610_v4  ;;  %546 = vmatpush3.bf16.msra.mxu1 %v630_v11  ;;  %v634_v18 = vld [vmem:[#allocation4 + $0x10] sm:$0xff]   ;;  %v635_v19 = vld [vmem:[#allocation4 + $0x58] sm:$0xff]   ;;  %v623_v20 = vld [vmem:[#allocation2 + $0x64] ss:$8 sps:$4 sm:$0xff]   ;;  %v76_v43 = vsub.s32 0, %v75_v42  ;;  %v80_v45 = vsub.s32 1, %v75_v42 }
  0x2d   :  { %168 = vmatprep.subr.bf16.mxu0 %v611_v5  ;;  %547 = vmatprep.subr.bf16.mxu1 %v631_v13  ;;  %v625_v21 = vld [vmem:[#allocation2 + $0x60] ss:$8 sps:$4 sm:$0xff]   ;;  %v626_v22 = vld [vmem:[#allocation2 + $0x74] ss:$8 sps:$4 sm:$0xff]   ;;  %v628_v26 = vld [vmem:[#allocation2 + $0x70] ss:$8 sps:$4 sm:$0xff]  }
  0x2e   :  { %v636_v23 = vld [vmem:[#allocation4 + $0x18] sm:$0xff]   ;;  %v637_v24 = vld [vmem:[#allocation4 + $0x60] sm:$0xff]   ;;  %v639_v27 = vld [vmem:[#allocation4 + $0x68] sm:$0xff]  }
  0x2f   :  { %v638_v25 = vld [vmem:[#allocation4 + $0x20] sm:$0xff]   ;;  %v640_v28 = vld [vmem:[#allocation4 + $0x28] sm:$0xff]   ;;  %v641_v30 = vld [vmem:[#allocation4 + $0x70] sm:$0xff]  }
  0x30   :  { %169 = vmatpush1.bf16.msra.mxu0 %v613_v6  ;;  %548 = vmatpush3.bf16.msra.mxu1 %v632_v14  ;;  %v55_v29 = vld [vmem:[%s813_s0] sm:$0xf]  ;;  %v642_v31 = vld [vmem:[#allocation4 + $0x30] sm:$0xff]   ;;  %v643_v32 = vld [vmem:[#allocation4 + $0x78] sm:$0xff]  }
  0x31   :  { %170 = vmatprep.subr.bf16.mxu0 %v614_v7  ;;  %549 = vmatprep.subr.bf16.mxu1 %v633_v15  ;;  %v644_v33 = vld [vmem:[#allocation4 + $0x38] sm:$0xff]   ;;  %v645_v34 = vld [vmem:[%s818_s5] sm:$0xff]   ;;  %v646_v36 = vld [vmem:[%s818_s5 + $0x8] sm:$0xff]  }
  0x32   :  { %v647_v37 = vld [vmem:[%s818_s5 + $0x10] sm:$0xff]   ;;  %v648_v38 = vld [vmem:[%s818_s5 + $0x18] sm:$0xff]   ;;  %v649_v39 = vld [vmem:[%s818_s5 + $0x20] sm:$0xff]  }
  0x33   :  { %v650_v40 = vld [vmem:[%s818_s5 + $0x28] sm:$0xff]   ;;  %v72_v44 = vld [vmem:[%s815_s2] sm:$0x3]  ;;  %v651_v58 = vld [vmem:[%s818_s5 + $0x30] sm:$0xff]  }
  0x34   :  { %171 = vmatpush1.bf16.msra.mxu0 %v616_v8  ;;  %550 = vmatpush3.bf16.msra.mxu1 %v634_v18  ;;  %v77_v46 = vrot.slane %v72_v44, %v76_v43  ;;  %v81_v47 = vrot.slane %v72_v44, %v80_v45  ;;  %v652_v59 = vld [vmem:[%s818_s5 + $0x38] sm:$0xff]   ;;  %v519_v61 = vld [vmem:[%s817_s4] ss:$0 sm:$0xff] }
  0x35   :  { %172 = vmatprep.subr.bf16.mxu0 %v617_v9  ;;  %551 = vmatprep.subr.bf16.mxu1 %v635_v19  ;;  %v536_v4 = vld [vmem:[%s819_s6] ss:$0 sm:$0xff] }
  0x38   :  { %173 = vmatpush1.bf16.msra.mxu0 %v619_v12  ;;  %552 = vmatpush3.bf16.msra.mxu1 %v636_v23 }
  0x39   :  { %174 = vmatprep.subr.bf16.mxu0 %v620_v16  ;;  %553 = vmatprep.subr.bf16.mxu1 %v637_v24 }
  0x3c   :  { %175 = vmatpush1.bf16.msra.mxu0 %v622_v17  ;;  %554 = vmatpush3.bf16.msra.mxu1 %v638_v25 }
  0x3d   :  { %176 = vmatprep.subr.bf16.mxu0 %v623_v20  ;;  %555 = vmatprep.subr.bf16.mxu1 %v639_v27 }
  0x40   :  { %177 = vmatpush1.bf16.msra.mxu0 %v625_v21  ;;  %556 = vmatpush3.bf16.msra.mxu1 %v640_v28 }
  0x41   :  { %178 = vmatprep.subr.bf16.mxu0 %v626_v22  ;;  %557 = vmatprep.subr.bf16.mxu1 %v641_v30 }
  0x44   :  { %179 = vmatpush1.bf16.msra.mxu0 %v628_v26  ;;  %558 = vmatpush3.bf16.msra.mxu1 %v642_v31 }
  0x45   :  { %559 = vmatprep.subr.bf16.mxu1 %v643_v32  ;;  %576 = vmatprep.subr.bf16.mxu0 %v708_v35 }
  0x47   :  { %197 = vmatmul.mubr.bf16.vlgmr.msra.gmra.mrb[0].mxu0 %v55_v29 }
  0x48   :  { %560 = vmatpush3.bf16.msra.mxu1 %v644_v33  ;;  %577 = vmatpush3.bf16.msra.mxu0 %v645_v34 }
  0x49   :  { %578 = vmatprep.subr.bf16.mxu0 %v708_v35  ;;  %592 = vmatprep.mubr.msk.bf16.mxu0 %vm709_vm0, %v708_v35 }
  0x4c   :  { %579 = vmatpush3.bf16.msra.mxu0 %v646_v36 }
  0x4d   :  { %580 = vmatprep.subr.bf16.mxu0 %v708_v35 }
  0x50   :  { %581 = vmatpush3.bf16.msra.mxu0 %v647_v37 }
  0x51   :  { %582 = vmatprep.subr.bf16.mxu0 %v708_v35 }
  0x54   :  { %583 = vmatpush3.bf16.msra.mxu0 %v648_v38 }
  0x55   :  { %584 = vmatprep.subr.bf16.mxu0 %v708_v35 }
  0x58   :  { %585 = vmatpush3.bf16.msra.mxu0 %v649_v39 }
  0x59   :  { %586 = vmatprep.subr.bf16.mxu0 %v708_v35 }
  0x5c   :  { %587 = vmatpush3.bf16.msra.mxu0 %v650_v40 }
  0x5d   :  { %588 = vmatprep.subr.bf16.mxu0 %v708_v35 }
  0x60   :  { %589 = vmatpush3.bf16.msra.mxu0 %v651_v58 }
  0x61   :  { %590 = vmatprep.subr.bf16.mxu0 %v708_v35 }
  0x64   :  { %591 = vmatpush3.bf16.msra.mxu0 %v652_v59 }
 0x11a   :  { %v198_v48 = vpop.f32.mrb[0].mxu0 }
 0x11b   :  { %v199_v49 = vadd.f32 %v198_v48, %v77_v46  ;;  %v200_v50 = vpop.f32.mrb[1].mxu0 }
 0x11c   :  { %v201_v51 = vadd.f32 %v200_v50, %v81_v47  ;;  %v202_v52 = vpop.f32.mrb[2].mxu0 }
 0x11d   :  { %v205_v53 = vmax.f32 %v199_v49, 0.0  ;;  %v203_v54 = vpop.f32.mrb[3].mxu0 }
 0x11e   :  { %v206_v55 = vmax.f32 %v201_v51, 0.0 }
 0x11f   :  { %v207_v57 = vpack.c.bf16 %v205_v53, %v205_v53 }
 0x120   :  { %v208_v56 = vpack.c.bf16 %v206_v55, %v206_v55 }
 0x122   :  { %376 = vmatprep.mubr.bf16.mxu1 %v208_v56 }
 0x123   :  { %377 = vmatmul.mubr.bf16.vlgmr.msra.gmra.mrb[0].mxu1 %v207_v57 }
 0x1f6   :  { %v561_v60 = vpop.f32.mrb[0].mxu1 }
 0x1f7   :  { %v562_v62 = vpop.f32.mrb[1].mxu1 }
 0x1f8   :  { %v563_v63 = vadd.f32 %v562_v62, %v561_v60  ;;  %v564_v0 = vpop.f32.mrb[2].mxu1 }
 0x1f9   :  { %v565_v1 = vpop.f32.mrb[3].mxu1 }
 0x1fa   :  { %v379_v2 = vadd.f32 %v563_v63, %v519_v61 }
 0x1fc   :  { %v384_v3 = vpack.c.bf16 %v379_v2, %v379_v2 }
 0x1fe   :  { %593 = vmatmul.mubr.bf16.vlgmr.msra.gmra.mrb[4].mxu0 %v384_v3 }
 0x2d1   :  { %v490_v5 = vpop.f32.mrb[4].mxu0 }
 0x2d2   :  { %v491_v6 = vadd.f32 %v536_v4, %v490_v5  ;;  %v594_v7 = vpop.f32.mrb[5].mxu0 }
 0x2d3   :  { %v493_v8 = vpop.f32.mrb[6].mxu0 }
 0x2d4   :  { %496 = vst [vmem:[%s820_s7] sm:$0xff] %v491_v6  ;;  %v595_v9 = vpop.f32.mrb[7].mxu0 }
 0x2d5   :  { %501 = vsyncpa [#allocation3], 1 }
 0x2d6   :  { %502 = vsyncpa [#allocation5], 1 }

</bundles_post_ra>
